<compile_context>
chip_gen: v6e
topology: v6e:2x2x1
jax: 0.10.0
libtpu: 0.0.40
codegen_flags: <defaults>
</compile_context>

<pallas_src>
import functools

import jax
import jax.numpy as jnp
from jax.experimental import pallas as pl
from jax.experimental.pallas import tpu as pltpu

HEAD_LANES = 128  # lane-dense packed head width (one full vreg lane row)


def _round_up(x, m):
    return (x + m - 1) // m * m


def _logp_offset(n_actions):
    # lanes [0,n): probs, lane n: value, lane n+1: entropy, lanes [off, off+n): log-probs
    return _round_up(n_actions + 2, 8)


# ----------------------------------------------------------------------------- kernel
def policy_kernel(x_ref,
                  w1_ref, b1_ref,
                  w2a_ref, b2a_ref,
                  w2c_ref, b2c_ref,
                  w3_ref, b3_ref,
                  out_ref,
                  *, n_actions):
    H = w2a_ref.shape[0]

    x = x_ref[...].astype(jnp.bfloat16)

    # ---- fused layer 1 (actor || critic): single MXU pass, x read once.
    h1 = jnp.dot(x, w1_ref[...], preferred_element_type=jnp.float32) + b1_ref[...]
    h1 = jnp.maximum(h1, 0.0).astype(jnp.bfloat16)
    ha = h1[:, :H]          # lane split at H (multiple of 128) -> no relayout
    hc = h1[:, H:]

    # ---- layer 2 (separate actor / critic hidden layers).
    ha2 = jnp.dot(ha, w2a_ref[...], preferred_element_type=jnp.float32) + b2a_ref[...]
    ha2 = jnp.maximum(ha2, 0.0).astype(jnp.bfloat16)
    hc2 = jnp.dot(hc, w2c_ref[...], preferred_element_type=jnp.float32) + b2c_ref[...]
    hc2 = jnp.maximum(hc2, 0.0).astype(jnp.bfloat16)

    # ---- fused lane-dense head: one [2H, 128] matmul produces
    #      lanes [0,n): logits, lane n: value, lanes [off, off+n): logits (dup), rest 0.
    h2 = jnp.concatenate([ha2, hc2], axis=-1)                     # [TB, 2H]
    head = jnp.dot(h2, w3_ref[...], preferred_element_type=jnp.float32) + b3_ref[...]

    off = _logp_offset(n_actions)
    lane = jax.lax.broadcasted_iota(jnp.int32, head.shape, 1)
    is_logit = lane < n_actions
    is_logp = jnp.logical_and(lane >= off, lane < off + n_actions)

    # softmax / log-softmax over the logit lanes only (padded lanes masked to -inf)
    logits = jnp.where(is_logit, head, -jnp.inf)
    m = jnp.max(logits, axis=-1, keepdims=True)
    e = jnp.exp(logits - m)                                       # 0 on masked lanes
    s = jnp.sum(e, axis=-1, keepdims=True)
    probs = e * pl.reciprocal(s, approx=True)                     # EUP slot, ~free
    log_s = jnp.log(s)

    logp_on_logit_lanes = jnp.where(is_logit, head - m - log_s, 0.0)
    entropy = -jnp.sum(probs * logp_on_logit_lanes, axis=-1, keepdims=True)

    out = probs                                                   # lanes [0, n)
    out = out + jnp.where(lane == n_actions, head, 0.0)           # value   (lane n)
    out = out + jnp.where(lane == n_actions + 1, entropy, 0.0)    # entropy (lane n+1)
    out = out + jnp.where(is_logp, head - m - log_s, 0.0)         # log-probs [off, off+n)
    out_ref[...] = out


# ----------------------------------------------------------------------------- wrappers
def policy_packed(x, fused, *, batch_tile=None):
    """Run the fused actor/critic kernel. Returns the packed [B, 128] head."""
    B, OBS = x.shape
    n_actions = fused["n_actions"]

    # 256 matches the v6e/v7x MXU; pass batch_tile=128 on v5e.  Tiny batches use
    # a single 8-aligned tile.
    if batch_tile is None:
        batch_tile = min(256, _round_up(max(B, 8), 8))
    Bp = _round_up(B, batch_tile)
    if Bp != B:
        x = jnp.pad(x, ((0, Bp - B), (0, 0)))

    args = (x,
            fused["w1"], fused["b1"],
            fused["w2a"], fused["b2a"],
            fused["w2c"], fused["b2c"],
            fused["w3"], fused["b3"])

    def resident(a):  # full-array block, constant index -> stays VMEM-resident
        return pl.BlockSpec(a.shape, lambda i: (0, 0))

    in_specs = [pl.BlockSpec((batch_tile, OBS), lambda i: (i, 0))]
    in_specs += [resident(a) for a in args[1:]]

    out = pl.pallas_call(
        functools.partial(policy_kernel, n_actions=n_actions),
        grid=(Bp // batch_tile,),
        in_specs=in_specs,
        out_specs=pl.BlockSpec((batch_tile, HEAD_LANES), lambda i: (i, 0)),
        out_shape=jax.ShapeDtypeStruct((Bp, HEAD_LANES), jnp.float32),
        compiler_params=pltpu.CompilerParams(
            dimension_semantics=("parallel",)),
    )(*args)
    return out[:B]


def policy_forward(x, fused, *, batch_tile=None):
    """Mirrors actor(x)/critic(x): returns (probs [B, n_actions], vals [B, 1])."""
    packed = policy_packed(x, fused, batch_tile=batch_tile)
    n = fused["n_actions"]
    return packed[:, :n], packed[:, n:n + 1]


def policy_eval(x, actions, fused, *, batch_tile=None):
    """Mirrors Policy.eval: (log_probs, vals, entropy) of Categorical(probs)."""
    packed = policy_packed(x, fused, batch_tile=batch_tile)
    n = fused["n_actions"]
    off = _logp_offset(n)
    vals = packed[:, n:n + 1]
    entropy = packed[:, n + 1]
    logp = packed[:, off:off + n]
    log_probs = jnp.take_along_axis(logp, actions[:, None], axis=-1)[:, 0]
    return log_probs, vals, entropy


# ----------------------------------------------------------------------------- params
def init_params(key, obs, n_actions, hidden):
    """Deterministic torch-style init; weights stored [in, out], biases [1, out]."""
    ks = jax.random.split(key, 12)

    def linear(kw, kb, fan_in, fan_out):
        bound = 1.0 / jnp.sqrt(fan_in)
        w = jax.random.uniform(kw, (fan_in, fan_out), jnp.float32, -bound, bound)
        b = jax.random.uniform(kb, (1, fan_out), jnp.float32, -bound, bound)
        return w, b

    p = {}
    p["w1a"], p["b1a"] = linear(ks[0], ks[1], obs, hidden)
    p["w2a"], p["b2a"] = linear(ks[2], ks[3], hidden, hidden)
    p["w3a"], p["b3a"] = linear(ks[4], ks[5], hidden, n_actions)
    p["w1c"], p["b1c"] = linear(ks[6], ks[7], obs, hidden)
    p["w2c"], p["b2c"] = linear(ks[8], ks[9], hidden, hidden)
    p["w3c"], p["b3c"] = linear(ks[10], ks[11], hidden, 1)
    return p


def prepare_params(params, n_actions):
    """Pack per-layer f32 params into the fused bf16 kernel layout (do once)."""
    H = params["w2a"].shape[0]
    off = _logp_offset(n_actions)

    w1 = jnp.concatenate([params["w1a"], params["w1c"]], axis=1).astype(jnp.bfloat16)
    b1 = jnp.concatenate([params["b1a"], params["b1c"]], axis=1).astype(jnp.float32)

    w3 = jnp.zeros((2 * H, HEAD_LANES), jnp.float32)
    w3 = w3.at[:H, :n_actions].set(params["w3a"])             # logits
    w3 = w3.at[:H, off:off + n_actions].set(params["w3a"])    # duplicated logits (log-softmax lanes)
    w3 = w3.at[H:, n_actions].set(params["w3c"][:, 0])        # value
    b3 = jnp.zeros((1, HEAD_LANES), jnp.float32)
    b3 = b3.at[0, :n_actions].set(params["b3a"][0])
    b3 = b3.at[0, off:off + n_actions].set(params["b3a"][0])
    b3 = b3.at[0, n_actions].set(params["b3c"][0, 0])

    return dict(
        w1=w1, b1=b1,
        w2a=params["w2a"].astype(jnp.bfloat16), b2a=params["b2a"].astype(jnp.float32),
        w2c=params["w2c"].astype(jnp.bfloat16), b2c=params["b2c"].astype(jnp.float32),
        w3=w3.astype(jnp.bfloat16), b3=b3,
        n_actions=n_actions, hidden=H)


# TODO(synk): for per-env-step inference at B~1, amortize the ~0.3 MiB weight DMA
# by batching env steps per call or prefetching weights across calls (P10 pattern).


if __name__ == "__main__":
    # LunarLander-v2: obs = 8, n_actions = 4; hidden_size default 256.
    B, OBS, N_ACTIONS, HIDDEN = 8, 8, 4, 256

    key = jax.random.PRNGKey(0)
    k_params, k_x, k_act = jax.random.split(key, 3)

    params = init_params(k_params, OBS, N_ACTIONS, HIDDEN)
    fused = prepare_params(params, N_ACTIONS)
    states = jax.random.normal(k_x, (B, OBS), jnp.float32)
    acts = jax.random.randint(k_act, (B,), 0, N_ACTIONS)

    probs, vals = policy_forward(states, fused)
    log_probs, vals2, entropy = policy_eval(states, acts, fused)
    jax.block_until_ready((probs, vals, log_probs, vals2, entropy))

    # ---- pure-JAX f32 reference of the original PyTorch module
    def reference(x, p):
        h = jnp.maximum(x @ p["w1a"] + p["b1a"], 0.0)
        h = jnp.maximum(h @ p["w2a"] + p["b2a"], 0.0)
        logits = h @ p["w3a"] + p["b3a"]
        rp = jax.nn.softmax(logits, axis=-1)
        c = jnp.maximum(x @ p["w1c"] + p["b1c"], 0.0)
        c = jnp.maximum(c @ p["w2c"] + p["b2c"], 0.0)
        rv = c @ p["w3c"] + p["b3c"]
        return rp, rv

    ref_probs, ref_vals = reference(states, params)

    assert probs.shape == (B, N_ACTIONS) and vals.shape == (B, 1)
    assert log_probs.shape == (B,) and entropy.shape == (B,)
    assert bool(jnp.allclose(jnp.sum(probs, axis=-1), 1.0, atol=1e-2))
    # bf16 weights / f32 accumulation -> loose tolerance vs f32 reference
    assert bool(jnp.allclose(probs, ref_probs, atol=5e-2))
    assert bool(jnp.allclose(vals, ref_vals, atol=5e-2, rtol=5e-2))
    # in-kernel log-softmax / entropy self-consistent with in-kernel probs
    kern_lp = jnp.log(jnp.take_along_axis(probs, acts[:, None], axis=-1))[:, 0]
    assert bool(jnp.allclose(log_probs, kern_lp, atol=1e-2))
    assert bool(jnp.allclose(entropy, -jnp.sum(probs * jnp.log(probs), axis=-1), atol=1e-2))

    print("KERNEL_OK")
</pallas_src>

<mosaic_0001>
module attributes {stable_mosaic.version = 11 : i64} {
  func.func @policy_kernel(%arg0: i32, %arg1: memref<8x8xf32, #tpu.memory_space<vmem>>, %arg2: memref<8x512xbf16, #tpu.memory_space<vmem>>, %arg3: memref<1x512xf32, #tpu.memory_space<vmem>>, %arg4: memref<256x256xbf16, #tpu.memory_space<vmem>>, %arg5: memref<1x256xf32, #tpu.memory_space<vmem>>, %arg6: memref<256x256xbf16, #tpu.memory_space<vmem>>, %arg7: memref<1x256xf32, #tpu.memory_space<vmem>>, %arg8: memref<512x128xbf16, #tpu.memory_space<vmem>>, %arg9: memref<1x128xf32, #tpu.memory_space<vmem>>, %arg10: memref<8x128xf32, #tpu.memory_space<vmem>>) attributes {dimension_semantics = [#tpu.dimension_semantics<parallel>], iteration_bounds = array<i64: 1>, scalar_prefetch = 0 : i64, scratch_operands = 0 : i64, tpu.core_type = #tpu.core_type<tc>, window_params = [{transform_indices = @transform_0, window_bounds = array<i64: 8, 8>}, {pipeline_mode = #tpu.pipeline_mode<synchronous>, transform_indices = @transform_1, window_bounds = array<i64: 8, 512>}, {pipeline_mode = #tpu.pipeline_mode<synchronous>, transform_indices = @transform_2, window_bounds = array<i64: 1, 512>}, {pipeline_mode = #tpu.pipeline_mode<synchronous>, transform_indices = @transform_3, window_bounds = array<i64: 256, 256>}, {pipeline_mode = #tpu.pipeline_mode<synchronous>, transform_indices = @transform_4, window_bounds = array<i64: 1, 256>}, {pipeline_mode = #tpu.pipeline_mode<synchronous>, transform_indices = @transform_5, window_bounds = array<i64: 256, 256>}, {pipeline_mode = #tpu.pipeline_mode<synchronous>, transform_indices = @transform_6, window_bounds = array<i64: 1, 256>}, {pipeline_mode = #tpu.pipeline_mode<synchronous>, transform_indices = @transform_7, window_bounds = array<i64: 512, 128>}, {pipeline_mode = #tpu.pipeline_mode<synchronous>, transform_indices = @transform_8, window_bounds = array<i64: 1, 128>}, {transform_indices = @transform_9, window_bounds = array<i64: 8, 128>}]} {
    %c0 = arith.constant 0 : index
    %c0_0 = arith.constant 0 : index
    %0 = vector.load %arg1[%c0, %c0_0] : memref<8x8xf32, #tpu.memory_space<vmem>>, vector<8x8xf32>
    %1 = arith.truncf %0 : vector<8x8xf32> to vector<8x8xbf16>
    %c0_1 = arith.constant 0 : index
    %c0_2 = arith.constant 0 : index
    %2 = vector.load %arg2[%c0_1, %c0_2] : memref<8x512xbf16, #tpu.memory_space<vmem>>, vector<8x512xbf16>
    %cst = arith.constant dense<0.000000e+00> : vector<8x512xf32>
    %3 = tpu.matmul %1, %2, %cst {dimension_numbers = #tpu.dot_dimension_numbers<[1], [0], [0], [1], [0, 0, 1, 1], [], []>} : vector<8x8xbf16>, vector<8x512xbf16>, vector<8x512xf32> -> vector<8x512xf32>
    %c0_3 = arith.constant 0 : index
    %c0_4 = arith.constant 0 : index
    %4 = vector.load %arg3[%c0_3, %c0_4] : memref<1x512xf32, #tpu.memory_space<vmem>>, vector<1x512xf32>
    %5 = vector.broadcast %4 : vector<1x512xf32> to vector<8x512xf32>
    %6 = arith.addf %3, %5 : vector<8x512xf32>
    %cst_5 = arith.constant 0.000000e+00 : f32
    %7 = vector.broadcast %cst_5 : f32 to vector<8x512xf32>
    %8 = arith.maximumf %6, %7 : vector<8x512xf32>
    %9 = arith.truncf %8 : vector<8x512xf32> to vector<8x512xbf16>
    %10 = vector.extract_strided_slice %9 {offsets = [0, 0], sizes = [8, 256], strides = [1, 1]} : vector<8x512xbf16> to vector<8x256xbf16>
    %11 = vector.extract_strided_slice %9 {offsets = [0, 256], sizes = [8, 256], strides = [1, 1]} : vector<8x512xbf16> to vector<8x256xbf16>
    %c0_6 = arith.constant 0 : index
    %c0_7 = arith.constant 0 : index
    %12 = vector.load %arg4[%c0_6, %c0_7] : memref<256x256xbf16, #tpu.memory_space<vmem>>, vector<256x256xbf16>
    %cst_8 = arith.constant dense<0.000000e+00> : vector<8x256xf32>
    %13 = tpu.matmul %10, %12, %cst_8 {dimension_numbers = #tpu.dot_dimension_numbers<[1], [0], [0], [1], [0, 0, 1, 1], [], []>} : vector<8x256xbf16>, vector<256x256xbf16>, vector<8x256xf32> -> vector<8x256xf32>
    %c0_9 = arith.constant 0 : index
    %c0_10 = arith.constant 0 : index
    %14 = vector.load %arg5[%c0_9, %c0_10] : memref<1x256xf32, #tpu.memory_space<vmem>>, vector<1x256xf32>
    %15 = vector.broadcast %14 : vector<1x256xf32> to vector<8x256xf32>
    %16 = arith.addf %13, %15 : vector<8x256xf32>
    %cst_11 = arith.constant 0.000000e+00 : f32
    %17 = vector.broadcast %cst_11 : f32 to vector<8x256xf32>
    %18 = arith.maximumf %16, %17 : vector<8x256xf32>
    %19 = arith.truncf %18 : vector<8x256xf32> to vector<8x256xbf16>
    %c0_12 = arith.constant 0 : index
    %c0_13 = arith.constant 0 : index
    %20 = vector.load %arg6[%c0_12, %c0_13] : memref<256x256xbf16, #tpu.memory_space<vmem>>, vector<256x256xbf16>
    %cst_14 = arith.constant dense<0.000000e+00> : vector<8x256xf32>
    %21 = tpu.matmul %11, %20, %cst_14 {dimension_numbers = #tpu.dot_dimension_numbers<[1], [0], [0], [1], [0, 0, 1, 1], [], []>} : vector<8x256xbf16>, vector<256x256xbf16>, vector<8x256xf32> -> vector<8x256xf32>
    %c0_15 = arith.constant 0 : index
    %c0_16 = arith.constant 0 : index
    %22 = vector.load %arg7[%c0_15, %c0_16] : memref<1x256xf32, #tpu.memory_space<vmem>>, vector<1x256xf32>
    %23 = vector.broadcast %22 : vector<1x256xf32> to vector<8x256xf32>
    %24 = arith.addf %21, %23 : vector<8x256xf32>
    %cst_17 = arith.constant 0.000000e+00 : f32
    %25 = vector.broadcast %cst_17 : f32 to vector<8x256xf32>
    %26 = arith.maximumf %24, %25 : vector<8x256xf32>
    %27 = arith.truncf %26 : vector<8x256xf32> to vector<8x256xbf16>
    %28 = tpu.concatenate %19, %27 in 1 : vector<8x256xbf16>, vector<8x256xbf16> -> vector<8x512xbf16>
    %c0_18 = arith.constant 0 : index
    %c0_19 = arith.constant 0 : index
    %29 = vector.load %arg8[%c0_18, %c0_19] : memref<512x128xbf16, #tpu.memory_space<vmem>>, vector<512x128xbf16>
    %cst_20 = arith.constant dense<0.000000e+00> : vector<8x128xf32>
    %30 = tpu.matmul %28, %29, %cst_20 {dimension_numbers = #tpu.dot_dimension_numbers<[1], [0], [0], [1], [0, 0, 1, 1], [], []>} : vector<8x512xbf16>, vector<512x128xbf16>, vector<8x128xf32> -> vector<8x128xf32>
    %c0_21 = arith.constant 0 : index
    %c0_22 = arith.constant 0 : index
    %31 = vector.load %arg9[%c0_21, %c0_22] : memref<1x128xf32, #tpu.memory_space<vmem>>, vector<1x128xf32>
    %32 = vector.broadcast %31 : vector<1x128xf32> to vector<8x128xf32>
    %33 = arith.addf %30, %32 : vector<8x128xf32>
    %34 = tpu.iota {dimensions = array<i32: 1>} : vector<8x128xi32>
    %c4_i32 = arith.constant 4 : i32
    %35 = vector.broadcast %c4_i32 : i32 to vector<8x128xi32>
    %36 = arith.cmpi slt, %34, %35 : vector<8x128xi32>
    %c8_i32 = arith.constant 8 : i32
    %37 = vector.broadcast %c8_i32 : i32 to vector<8x128xi32>
    %38 = arith.cmpi sge, %34, %37 : vector<8x128xi32>
    %c12_i32 = arith.constant 12 : i32
    %39 = vector.broadcast %c12_i32 : i32 to vector<8x128xi32>
    %40 = arith.cmpi slt, %34, %39 : vector<8x128xi32>
    %41 = arith.andi %38, %40 : vector<8x128xi1>
    %cst_23 = arith.constant 0xFF800000 : f32
    %42 = vector.broadcast %cst_23 : f32 to vector<8x128xf32>
    %43 = arith.select %36, %33, %42 : vector<8x128xi1>, vector<8x128xf32>
    %cst_24 = arith.constant dense<0xFF800000> : vector<8xf32>
    %44 = vector.multi_reduction <maximumf>, %43, %cst_24 [1] : vector<8x128xf32> to vector<8xf32>
    %45 = vector.shape_cast %44 : vector<8xf32> to vector<8x1xf32>
    %46 = vector.broadcast %45 : vector<8x1xf32> to vector<8x128xf32>
    %47 = arith.subf %43, %46 : vector<8x128xf32>
    %48 = math.exp %47 : vector<8x128xf32>
    %cst_25 = arith.constant dense<0.000000e+00> : vector<8xf32>
    %49 = vector.multi_reduction <add>, %48, %cst_25 [1] : vector<8x128xf32> to vector<8xf32>
    %50 = vector.shape_cast %49 : vector<8xf32> to vector<8x1xf32>
    %51 = tpu.reciprocal %50 {approx = true} : vector<8x1xf32> -> vector<8x1xf32>
    %52 = vector.broadcast %51 : vector<8x1xf32> to vector<8x128xf32>
    %53 = arith.mulf %48, %52 : vector<8x128xf32>
    %54 = math.log %50 : vector<8x1xf32>
    %55 = vector.broadcast %45 : vector<8x1xf32> to vector<8x128xf32>
    %56 = arith.subf %33, %55 : vector<8x128xf32>
    %57 = vector.broadcast %54 : vector<8x1xf32> to vector<8x128xf32>
    %58 = arith.subf %56, %57 : vector<8x128xf32>
    %cst_26 = arith.constant 0.000000e+00 : f32
    %59 = vector.broadcast %cst_26 : f32 to vector<8x128xf32>
    %60 = arith.select %36, %58, %59 : vector<8x128xi1>, vector<8x128xf32>
    %61 = arith.mulf %53, %60 : vector<8x128xf32>
    %cst_27 = arith.constant dense<0.000000e+00> : vector<8xf32>
    %62 = vector.multi_reduction <add>, %61, %cst_27 [1] : vector<8x128xf32> to vector<8xf32>
    %63 = vector.shape_cast %62 : vector<8xf32> to vector<8x1xf32>
    %cst_28 = arith.constant 0.000000e+00 : f32
    %64 = vector.broadcast %cst_28 : f32 to vector<8x1xf32>
    %65 = arith.subf %64, %63 : vector<8x1xf32>
    %c4_i32_29 = arith.constant 4 : i32
    %66 = vector.broadcast %c4_i32_29 : i32 to vector<8x128xi32>
    %67 = arith.cmpi eq, %34, %66 : vector<8x128xi32>
    %cst_30 = arith.constant 0.000000e+00 : f32
    %68 = vector.broadcast %cst_30 : f32 to vector<8x128xf32>
    %69 = arith.select %67, %33, %68 : vector<8x128xi1>, vector<8x128xf32>
    %70 = arith.addf %53, %69 : vector<8x128xf32>
    %c5_i32 = arith.constant 5 : i32
    %71 = vector.broadcast %c5_i32 : i32 to vector<8x128xi32>
    %72 = arith.cmpi eq, %34, %71 : vector<8x128xi32>
    %cst_31 = arith.constant 0.000000e+00 : f32
    %73 = vector.shape_cast %65 : vector<8x1xf32> to vector<8x1xf32>
    %74 = vector.broadcast %73 : vector<8x1xf32> to vector<8x128xf32>
    %75 = vector.broadcast %cst_31 : f32 to vector<8x128xf32>
    %76 = arith.select %72, %74, %75 : vector<8x128xi1>, vector<8x128xf32>
    %77 = arith.addf %70, %76 : vector<8x128xf32>
    %78 = vector.broadcast %45 : vector<8x1xf32> to vector<8x128xf32>
    %79 = arith.subf %33, %78 : vector<8x128xf32>
    %80 = vector.broadcast %54 : vector<8x1xf32> to vector<8x128xf32>
    %81 = arith.subf %79, %80 : vector<8x128xf32>
    %cst_32 = arith.constant 0.000000e+00 : f32
    %82 = vector.broadcast %cst_32 : f32 to vector<8x128xf32>
    %83 = arith.select %41, %81, %82 : vector<8x128xi1>, vector<8x128xf32>
    %84 = arith.addf %77, %83 : vector<8x128xf32>
    %c0_33 = arith.constant 0 : index
    %c0_34 = arith.constant 0 : index
    %85 = vector.load %arg10[%c0_33, %c0_34] : memref<8x128xf32, #tpu.memory_space<vmem>>, vector<8x128xf32>
    tpu.vector_store %arg10[%c0_33, %c0_34], %84 {strides = array<i32>} : memref<8x128xf32, #tpu.memory_space<vmem>>, vector<8x128xf32>,
    return
  }
  func.func @transform_0(%arg0: i32) -> (i32, i32) {
    %c0_i32 = arith.constant 0 : i32
    %c0_i32_0 = arith.constant 0 : i32
    return %arg0, %c0_i32 : i32, i32
  }
  func.func @transform_1(%arg0: i32) -> (i32, i32) {
    %c0_i32 = arith.constant 0 : i32
    %c0_i32_0 = arith.constant 0 : i32
    %c0_i32_1 = arith.constant 0 : i32
    return %c0_i32, %c0_i32_0 : i32, i32
  }
  func.func @transform_2(%arg0: i32) -> (i32, i32) {
    %c0_i32 = arith.constant 0 : i32
    %c0_i32_0 = arith.constant 0 : i32
    %c0_i32_1 = arith.constant 0 : i32
    return %c0_i32, %c0_i32_0 : i32, i32
  }
  func.func @transform_3(%arg0: i32) -> (i32, i32) {
    %c0_i32 = arith.constant 0 : i32
    %c0_i32_0 = arith.constant 0 : i32
    %c0_i32_1 = arith.constant 0 : i32
    return %c0_i32, %c0_i32_0 : i32, i32
  }
  func.func @transform_4(%arg0: i32) -> (i32, i32) {
    %c0_i32 = arith.constant 0 : i32
    %c0_i32_0 = arith.constant 0 : i32
    %c0_i32_1 = arith.constant 0 : i32
    return %c0_i32, %c0_i32_0 : i32, i32
  }
  func.func @transform_5(%arg0: i32) -> (i32, i32) {
    %c0_i32 = arith.constant 0 : i32
    %c0_i32_0 = arith.constant 0 : i32
    %c0_i32_1 = arith.constant 0 : i32
    return %c0_i32, %c0_i32_0 : i32, i32
  }
  func.func @transform_6(%arg0: i32) -> (i32, i32) {
    %c0_i32 = arith.constant 0 : i32
    %c0_i32_0 = arith.constant 0 : i32
    %c0_i32_1 = arith.constant 0 : i32
    return %c0_i32, %c0_i32_0 : i32, i32
  }
  func.func @transform_7(%arg0: i32) -> (i32, i32) {
    %c0_i32 = arith.constant 0 : i32
    %c0_i32_0 = arith.constant 0 : i32
    %c0_i32_1 = arith.constant 0 : i32
    return %c0_i32, %c0_i32_0 : i32, i32
  }
  func.func @transform_8(%arg0: i32) -> (i32, i32) {
    %c0_i32 = arith.constant 0 : i32
    %c0_i32_0 = arith.constant 0 : i32
    %c0_i32_1 = arith.constant 0 : i32
    return %c0_i32, %c0_i32_0 : i32, i32
  }
  func.func @transform_9(%arg0: i32) -> (i32, i32) {
    %c0_i32 = arith.constant 0 : i32
    %c0_i32_0 = arith.constant 0 : i32
    return %arg0, %c0_i32 : i32, i32
  }
}

</mosaic_0001>

<bundles_post_ra>
// kernel: tpu_custom_call.1
= control target key start
LH: loop header
LB: loop body
LE: loop exit
PB: predicated region body
PF: predicated region fallthrough
CT: control target
= control target key end

     0   :  { %14 = vsyncpa [#allocation3], 0  ;;  %s1707_s0 = inlined_call_operand.hbm [shape: f32[8,8], index: 0, kind: input, shape index: {}]   ;;  %s1708_s1 = inlined_call_operand.hbm [shape: bf16[8,512], index: 1, kind: input, shape index: {}]   ;;  %s1709_s2 = inlined_call_operand.hbm [shape: f32[1,512], index: 2, kind: input, shape index: {}]   ;;  %s1710_s3 = inlined_call_operand.hbm [shape: bf16[256,256], index: 3, kind: input, shape index: {}]   ;;  %s1711_s4 = inlined_call_operand.vmem [shape: f32[1,256], index: 4, kind: input, shape index: {}]   ;;  %s1712_s5 = inlined_call_operand.hbm [shape: bf16[256,256], index: 5, kind: input, shape index: {}]   ;;  %s1713_s6 = inlined_call_operand.vmem [shape: f32[1,256], index: 6, kind: input, shape index: {}]   ;;  %s1714_s7 = inlined_call_operand.hbm [shape: bf16[512,128], index: 7, kind: input, shape index: {}]   ;;  %s1715_s8 = inlined_call_operand.vmem [shape: f32[1,128], index: 8, kind: input, shape index: {}]   ;;  %s1716_s9 = inlined_call_operand.hbm [shape: f32[8,128], index: 9, kind: output, shape index: {}]  }
   0x1   :  { %15 = vsyncpa [#allocation6], 0 }
   0x2   :  { %16 = vsyncpa [#allocation9], 0 }
   0x3   :  { %17 = vsyncpa [#allocation12], 0 }
   0x4   :  { %18 = vsyncpa [#allocation4], 0  ;;  %s1595_s30 = smov [#allocation5]   ;;  %s1596_s11 = smov [#allocation8]  }
   0x5   :  { %s35_s10 = sshll.u32 %s1595_s30, 4  ;;  %s54_s12 = sshll.u32 %s1596_s11, 4  ;;  %s36_s10 = int_to_ptr.vmem [resolvable:$true] %s35_s10  ;;  %s55_s12 = int_to_ptr.vmem [resolvable:$true] %s54_s12 }
   0x6   :  { %s1453_s13 = scalar_lea.vmem %s36_s10, 256  ;;  %p1458_p1 = scmp.lt.s32.totalorder %s36_s10, %s36_s10 }
   0x7   :  { %p1454_p0 = scmp.ne.s32.totalorder %s36_s10, %s1453_s13  ;;  %p1459_p2 = scmp.lt.s32.totalorder %s1453_s13, %s1453_s13 }
   0x9   :  { %p1460_p3 = por %p1459_p2, %p1458_p1 }
   0xb   :  { %p1461_p4 = pnand %p1460_p3, %p1454_p0 }
   0xd   :  { %1464 = shalt.err (!%p1461_p4)
}
   0xe   :  { %38 = dma.hbm_to_vmem [thread:$0]  %s1708_s1, 256, %s36_s10, [#allocation6]  }
   0xf   :  { %s1473_s16 = scalar_lea.vmem %s55_s12, 4096  ;;  %p1478_p6 = scmp.lt.s32.totalorder %s55_s12, %s55_s12 }
  0x10   :  { %p1474_p5 = scmp.ne.s32.totalorder %s55_s12, %s1473_s16  ;;  %p1479_p7 = scmp.lt.s32.totalorder %s1473_s16, %s1473_s16 }
  0x12   :  { %p1480_p8 = por %p1479_p7, %p1478_p6 }
  0x14   :  { %p1481_p9 = pnand %p1480_p8, %p1474_p5 }
  0x16   :  { %1484 = shalt.err (!%p1481_p9)
}
  0x17   :  { %s1597_s17 = smov 128   ;;  %s1598_s18 = smov 8  }
  0x18   :  { %60 = dma.hbm_to_vmem [thread:$0]  %s1710_s3, 4096, %s55_s12, [#allocation9], %s1597_s17, %s1597_s17, %s1598_s18  }
  0x19   :  { %s1599_s21 = smov [#allocation2]   ;;  %s1600_s23 = smov [#allocation7]  }
  0x1a   :  { %s25_s22 = sshll.u32 %s1599_s21, 4  ;;  %s45_s1 = sshll.u32 %s1600_s23, 4  ;;  %s26_s22 = int_to_ptr.vmem [resolvable:$true] %s25_s22  ;;  %s46_s1 = int_to_ptr.vmem [resolvable:$true] %s45_s1 }
  0x1b   :  { %s1493_s24 = scalar_lea.vmem %s26_s22, 128  ;;  %p1498_p11 = scmp.lt.s32.totalorder %s26_s22, %s26_s22 }
  0x1c   :  { %p1494_p10 = scmp.ne.s32.totalorder %s26_s22, %s1493_s24  ;;  %p1499_p12 = scmp.lt.s32.totalorder %s1493_s24, %s1493_s24 }
  0x1e   :  { %p1500_p13 = por %p1499_p12, %p1498_p11 }
  0x20   :  { %p1501_p0 = pnand %p1500_p13, %p1494_p10 }
  0x22   :  { %1504 = shalt.err (!%p1501_p0)
}
  0x23   :  { %28 = dma.hbm_to_vmem [thread:$0]  %s1707_s0, 128, %s26_s22, [#allocation3]  }
  0x24   :  { %s1513_s27 = scalar_lea.vmem %s46_s1, 64  ;;  %p1518_p2 = scmp.lt.s32.totalorder %s46_s1, %s46_s1 }
  0x25   :  { %p1514_p1 = scmp.ne.s32.totalorder %s46_s1, %s1513_s27  ;;  %p1519_p3 = scmp.lt.s32.totalorder %s1513_s27, %s1513_s27 }
  0x27   :  { %p1520_p4 = por %p1519_p3, %p1518_p2 }
  0x29   :  { %p1521_p5 = pnand %p1520_p4, %p1514_p1 }
  0x2b   :  { %1524 = shalt.err (!%p1521_p5)
}
  0x2c   :  { %48 = dma.hbm_to_vmem [thread:$0]  %s1709_s2, 64, %s46_s1, [#allocation6]  }
  0x2d   :  { %s1601_s29 = smov [#allocation10]   ;;  %s1602_s10 = smov [#allocation11]  }
  0x2e   :  { %s68_s30 = sshll.u32 %s1601_s29, 4  ;;  %s82_s11 = sshll.u32 %s1602_s10, 4  ;;  %s69_s30 = int_to_ptr.vmem [resolvable:$true] %s68_s30  ;;  %s83_s11 = int_to_ptr.vmem [resolvable:$true] %s82_s11 }
  0x2f   :  { %s1533_s12 = scalar_lea.vmem %s69_s30, 4096  ;;  %p1538_p7 = scmp.lt.s32.totalorder %s69_s30, %s69_s30 }
  0x30   :  { %p1534_p6 = scmp.ne.s32.totalorder %s69_s30, %s1533_s12  ;;  %p1539_p8 = scmp.lt.s32.totalorder %s1533_s12, %s1533_s12 }
  0x32   :  { %p1540_p9 = por %p1539_p8, %p1538_p7 }
  0x34   :  { %p1541_p10 = pnand %p1540_p9, %p1534_p6 }
  0x36   :  { %1544 = shalt.err (!%p1541_p10)
}
  0x37   :  { %74 = dma.hbm_to_vmem [thread:$0]  %s1712_s5, 4096, %s69_s30, [#allocation9], %s1597_s17, %s1597_s17, %s1598_s18  }
  0x38   :  { %s1553_s2 = scalar_lea.vmem %s83_s11, 4096  ;;  %p1558_p12 = scmp.lt.s32.totalorder %s83_s11, %s83_s11 }
  0x39   :  { %p1554_p11 = scmp.ne.s32.totalorder %s83_s11, %s1553_s2  ;;  %p1559_p13 = scmp.lt.s32.totalorder %s1553_s2, %s1553_s2 }
  0x3b   :  { %p1560_p0 = por %p1559_p13, %p1558_p12 }
  0x3d   :  { %p1561_p1 = pnand %p1560_p0, %p1554_p11 }
  0x3f   :  { %1564 = shalt.err (!%p1561_p1)
}
  0x40   :  { %s1603_s14 = smov 64   ;;  %s1604_s15 = smov 4  }
  0x41   :  { %88 = dma.hbm_to_vmem [thread:$0]  %s1714_s7, 4096, %s83_s11, [#allocation12], %s1603_s14, %s1603_s14, %s1604_s15  }
  0x42   :  { %1585 = dma.done.wait [#allocation3], 128  }
  0x43   :  { %1586 = vsyncadd [#allocation3], 4294967168 }
  0x44   :  { %1587 = dma.done.wait [#allocation6], 320  }
  0x45   :  { %1588 = vsyncadd [#allocation6], 4294966976 }
  0x46   :  { %1589 = dma.done.wait [#allocation9], 8192  }
  0x47   :  { %1590 = vsyncadd [#allocation9], 4294959104 }
  0x48   :  { %1591 = dma.done.wait [#allocation12], 4096  }
  0x49   :  { %1592 = vsyncadd [#allocation12], 4294963200  ;;  %v1605_v0 = vmov 0   ;;  %v112_v1 = vld [vmem:[#allocation5] sm:$0xff]  ;;  %vm150_vm0 = vcmask 1043456   ;;  %v113_v2 = vld [vmem:[#allocation5 + $0x8] sm:$0xff] }
  0x4a   :  { %195 = vmatprep.mubr.bf16.mxu0 %v1605_v0  ;;  %236 = vmatprep.mubr.bf16.mxu1 %v1605_v0  ;;  %v110_v3 = vld [vmem:[#allocation2] sm:$0xff]  ;;  %v1147_v4 = vcombine.high %v112_v1, %v112_v1  ;;  %v1149_v5 = vcombine.high %v113_v2, %v113_v2  ;;  %v1146_v6 = vcombine.low %v112_v1, %v112_v1  ;;  %v1313_v8 = vld [vmem:[#allocation8 + $0x74] ss:$8 sps:$4 sm:$0xff]   ;;  %v1311_v12 = vld [vmem:[#allocation8 + $0x70] ss:$8 sps:$4 sm:$0xff]   ;;  %vm146_vm1 = vcmask 64512  }
  0x4b   :  { %v1148_v7 = vcombine.low %v113_v2, %v113_v2  ;;  %v111_v11 = vpack.c.bf16 %v110_v3, %v110_v3  ;;  %v1316_v13 = vld [vmem:[#allocation10 + $0x74] ss:$8 sps:$4 sm:$0xff]   ;;  %v1314_v14 = vld [vmem:[#allocation10 + $0x70] ss:$8 sps:$4 sm:$0xff]   ;;  %v1319_v15 = vld [vmem:[#allocation8 + $0x64] ss:$8 sps:$4 sm:$0xff]  }
  0x4c   :  { %1150 = vmatprep.subr.msk.bf16.mxu0 %vm150_vm0, %v1147_v4  ;;  %1152 = vmatprep.subr.msk.bf16.mxu1 %vm150_vm0, %v1149_v5  ;;  %v152_v9 = vsel %vm150_vm0, %v1146_v6, 0  ;;  %v1322_v16 = vld [vmem:[#allocation10 + $0x64] ss:$8 sps:$4 sm:$0xff]   ;;  %v1317_v17 = vld [vmem:[#allocation8 + $0x60] ss:$8 sps:$4 sm:$0xff]  }
  0x4d   :  { %v158_v10 = vsel %vm150_vm0, %v1148_v7, 0  ;;  %178 = vmatpush1.bf16.msra.mxu0 %v152_v9  ;;  %v1320_v18 = vld [vmem:[#allocation10 + $0x60] ss:$8 sps:$4 sm:$0xff]   ;;  %v1325_v19 = vld [vmem:[#allocation8 + $0x54] ss:$8 sps:$4 sm:$0xff]  }
  0x4e   :  { %219 = vmatpush1.bf16.msra.mxu1 %v158_v10  ;;  %457 = vmatprep.subr.bf16.mxu0 %v1313_v8  ;;  %v1328_v20 = vld [vmem:[#allocation10 + $0x54] ss:$8 sps:$4 sm:$0xff]   ;;  %v1323_v21 = vld [vmem:[#allocation8 + $0x50] ss:$8 sps:$4 sm:$0xff]   ;;  %v1331_v23 = vld [vmem:[#allocation8 + $0x44] ss:$8 sps:$4 sm:$0xff]  }
  0x4f   :  { %706 = vmatprep.subr.bf16.mxu1 %v1316_v13  ;;  %v1326_v22 = vld [vmem:[#allocation10 + $0x50] ss:$8 sps:$4 sm:$0xff]   ;;  %v1334_v24 = vld [vmem:[#allocation10 + $0x44] ss:$8 sps:$4 sm:$0xff]   ;;  %v1329_v25 = vld [vmem:[#allocation8 + $0x40] ss:$8 sps:$4 sm:$0xff]   ;;  %v116_v13 = vlaneseq }
  0x50   :  { %1151 = vmatmul.mubr.msk.bf16.vlgmr.msra.gmra.mxu0 %vm146_vm1, %v111_v11  ;;  %v1332_v26 = vld [vmem:[#allocation10 + $0x40] ss:$8 sps:$4 sm:$0xff]   ;;  %v1337_v27 = vld [vmem:[#allocation8 + $0x34] ss:$8 sps:$4 sm:$0xff]   ;;  %v1335_v29 = vld [vmem:[#allocation8 + $0x30] ss:$8 sps:$4 sm:$0xff]  }
  0x51   :  { %1153 = vmatmul.mubr.msk.bf16.vlgmr.msra.gmra.mxu1 %vm146_vm1, %v111_v11  ;;  %458 = vmatpush1.bf16.msra.mxu0 %v1311_v12  ;;  %v1340_v28 = vld [vmem:[#allocation10 + $0x34] ss:$8 sps:$4 sm:$0xff]   ;;  %v1338_v30 = vld [vmem:[#allocation10 + $0x30] ss:$8 sps:$4 sm:$0xff]   ;;  %v1343_v31 = vld [vmem:[#allocation8 + $0x24] ss:$8 sps:$4 sm:$0xff]  }
  0x52   :  { %707 = vmatpush1.bf16.msra.mxu1 %v1314_v14  ;;  %459 = vmatprep.subr.bf16.mxu0 %v1319_v15  ;;  %v1346_v32 = vld [vmem:[#allocation10 + $0x24] ss:$8 sps:$4 sm:$0xff]   ;;  %v1341_v33 = vld [vmem:[#allocation8 + $0x20] ss:$8 sps:$4 sm:$0xff]   ;;  %v1349_v35 = vld [vmem:[#allocation8 + $0x14] ss:$8 sps:$4 sm:$0xff]  }
  0x53   :  { %708 = vmatprep.subr.bf16.mxu1 %v1322_v16  ;;  %v1344_v34 = vld [vmem:[#allocation10 + $0x20] ss:$8 sps:$4 sm:$0xff]   ;;  %v1352_v36 = vld [vmem:[#allocation10 + $0x14] ss:$8 sps:$4 sm:$0xff]   ;;  %v1347_v37 = vld [vmem:[#allocation8 + $0x10] ss:$8 sps:$4 sm:$0xff]  }
  0x54   :  { %v1350_v38 = vld [vmem:[#allocation10 + $0x10] ss:$8 sps:$4 sm:$0xff]   ;;  %v1355_v39 = vld [vmem:[#allocation8 + $0x4] ss:$8 sps:$4 sm:$0xff]   ;;  %v1353_v41 = vld [vmem:[#allocation8] ss:$8 sps:$4 sm:$0xff]  }
  0x55   :  { %460 = vmatpush1.bf16.msra.mxu0 %v1317_v17  ;;  %v1358_v40 = vld [vmem:[#allocation10 + $0x4] ss:$8 sps:$4 sm:$0xff]   ;;  %v1356_v42 = vld [vmem:[#allocation10] ss:$8 sps:$4 sm:$0xff]   ;;  %v1361_v43 = vld [vmem:[#allocation8 + $0xf4] ss:$8 sps:$4 sm:$0xff]  }
  0x56   :  { %709 = vmatpush1.bf16.msra.mxu1 %v1320_v18  ;;  %461 = vmatprep.subr.bf16.mxu0 %v1325_v19  ;;  %v1364_v44 = vld [vmem:[#allocation10 + $0xf4] ss:$8 sps:$4 sm:$0xff]   ;;  %v1359_v45 = vld [vmem:[#allocation8 + $0xf0] ss:$8 sps:$4 sm:$0xff]   ;;  %v1367_v47 = vld [vmem:[#allocation8 + $0xe4] ss:$8 sps:$4 sm:$0xff]  }
  0x57   :  { %710 = vmatprep.subr.bf16.mxu1 %v1328_v20  ;;  %v1362_v46 = vld [vmem:[#allocation10 + $0xf0] ss:$8 sps:$4 sm:$0xff]   ;;  %v1370_v48 = vld [vmem:[#allocation10 + $0xe4] ss:$8 sps:$4 sm:$0xff]   ;;  %v1365_v49 = vld [vmem:[#allocation8 + $0xe0] ss:$8 sps:$4 sm:$0xff]  }
  0x58   :  { %v1368_v50 = vld [vmem:[#allocation10 + $0xe0] ss:$8 sps:$4 sm:$0xff]   ;;  %v1373_v51 = vld [vmem:[#allocation8 + $0xd4] ss:$8 sps:$4 sm:$0xff]   ;;  %v1371_v53 = vld [vmem:[#allocation8 + $0xd0] ss:$8 sps:$4 sm:$0xff]  }
  0x59   :  { %462 = vmatpush1.bf16.msra.mxu0 %v1323_v21  ;;  %v1376_v52 = vld [vmem:[#allocation10 + $0xd4] ss:$8 sps:$4 sm:$0xff]   ;;  %v1374_v54 = vld [vmem:[#allocation10 + $0xd0] ss:$8 sps:$4 sm:$0xff]   ;;  %v1379_v55 = vld [vmem:[#allocation8 + $0xc4] ss:$8 sps:$4 sm:$0xff]  }
  0x5a   :  { %711 = vmatpush1.bf16.msra.mxu1 %v1326_v22  ;;  %463 = vmatprep.subr.bf16.mxu0 %v1331_v23  ;;  %v1382_v56 = vld [vmem:[#allocation10 + $0xc4] ss:$8 sps:$4 sm:$0xff]   ;;  %v1377_v57 = vld [vmem:[#allocation8 + $0xc0] ss:$8 sps:$4 sm:$0xff]   ;;  %v1385_v59 = vld [vmem:[#allocation8 + $0xb4] ss:$8 sps:$4 sm:$0xff]  }
  0x5b   :  { %712 = vmatprep.subr.bf16.mxu1 %v1334_v24  ;;  %v1380_v58 = vld [vmem:[#allocation10 + $0xc0] ss:$8 sps:$4 sm:$0xff]   ;;  %v1388_v60 = vld [vmem:[#allocation10 + $0xb4] ss:$8 sps:$4 sm:$0xff]   ;;  %v1383_v61 = vld [vmem:[#allocation8 + $0xb0] ss:$8 sps:$4 sm:$0xff]  }
  0x5c   :  { %v1386_v62 = vld [vmem:[#allocation10 + $0xb0] ss:$8 sps:$4 sm:$0xff]   ;;  %v1391_v63 = vld [vmem:[#allocation8 + $0xa4] ss:$8 sps:$4 sm:$0xff]   ;;  %v1389_v1 = vld [vmem:[#allocation8 + $0xa0] ss:$8 sps:$4 sm:$0xff]  }
  0x5d   :  { %464 = vmatpush1.bf16.msra.mxu0 %v1329_v25  ;;  %v1394_v0 = vld [vmem:[#allocation10 + $0xa4] ss:$8 sps:$4 sm:$0xff]   ;;  %v1392_v2 = vld [vmem:[#allocation10 + $0xa0] ss:$8 sps:$4 sm:$0xff]   ;;  %v1397_v3 = vld [vmem:[#allocation8 + $0x94] ss:$8 sps:$4 sm:$0xff]  }
  0x5e   :  { %713 = vmatpush1.bf16.msra.mxu1 %v1332_v26  ;;  %465 = vmatprep.subr.bf16.mxu0 %v1337_v27  ;;  %v1400_v4 = vld [vmem:[#allocation10 + $0x94] ss:$8 sps:$4 sm:$0xff]   ;;  %v1395_v5 = vld [vmem:[#allocation8 + $0x90] ss:$8 sps:$4 sm:$0xff]   ;;  %v1403_v7 = vld [vmem:[#allocation8 + $0x84] ss:$8 sps:$4 sm:$0xff]  }
  0x5f   :  { %714 = vmatprep.subr.bf16.mxu1 %v1340_v28  ;;  %v1398_v6 = vld [vmem:[#allocation10 + $0x90] ss:$8 sps:$4 sm:$0xff]   ;;  %v1406_v8 = vld [vmem:[#allocation10 + $0x84] ss:$8 sps:$4 sm:$0xff]   ;;  %v1401_v9 = vld [vmem:[#allocation8 + $0x80] ss:$8 sps:$4 sm:$0xff]  }
  0x60   :  { %v1404_v10 = vld [vmem:[#allocation10 + $0x80] ss:$8 sps:$4 sm:$0xff]   ;;  %v1407_v11 = vld [vmem:[#allocation11 + $0x78] sm:$0xff]   ;;  %v117_v14 = vshrl.u32 %v116_v13, 7 }
  0x61   :  { %466 = vmatpush1.bf16.msra.mxu0 %v1335_v29  ;;  %v1408_v12 = vld [vmem:[#allocation11 + $0xf8] sm:$0xff]  }
  0x62   :  { %715 = vmatpush1.bf16.msra.mxu1 %v1338_v30  ;;  %467 = vmatprep.subr.bf16.mxu0 %v1343_v31  ;;  %v1682_v15 = vsub.s32 0, %v117_v14  ;;  %v126_v16 = vsub.s32 2, %v117_v14  ;;  %v114_v17 = vld [vmem:[#allocation7] sm:$0xf]  ;;  %v1684_v18 = vsub.s32 1, %v117_v14  ;;  %v130_v19 = vsub.s32 3, %v117_v14 }
  0x63   :  { %716 = vmatprep.subr.bf16.mxu1 %v1346_v32 }
  0x64   :  { %v119_v20 = vrot.slane %v114_v17, %v1682_v15  ;;  %v127_v21 = vrot.slane %v114_v17, %v126_v16  ;;  %v123_v22 = vrot.slane %v114_v17, %v1684_v18  ;;  %v131_v23 = vrot.slane %v114_v17, %v130_v19 }
  0x65   :  { %468 = vmatpush1.bf16.msra.mxu0 %v1341_v33 }
  0x66   :  { %717 = vmatpush1.bf16.msra.mxu1 %v1344_v34  ;;  %469 = vmatprep.subr.bf16.mxu0 %v1349_v35 }
  0x67   :  { %718 = vmatprep.subr.bf16.mxu1 %v1352_v36 }
  0x69   :  { %470 = vmatpush1.bf16.msra.mxu0 %v1347_v37 }
  0x6a   :  { %719 = vmatpush1.bf16.msra.mxu1 %v1350_v38  ;;  %471 = vmatprep.subr.bf16.mxu0 %v1355_v39 }
  0x6b   :  { %720 = vmatprep.subr.bf16.mxu1 %v1358_v40 }
  0x6d   :  { %472 = vmatpush1.bf16.msra.mxu0 %v1353_v41 }
  0x6e   :  { %721 = vmatpush1.bf16.msra.mxu1 %v1356_v42  ;;  %473 = vmatprep.subr.bf16.mxu0 %v1361_v43  ;;  %v1409_v43 = vld [vmem:[#allocation11 + $0x38] sm:$0xff]  }
  0x6f   :  { %722 = vmatprep.subr.bf16.mxu1 %v1364_v44  ;;  %v1410_v44 = vld [vmem:[#allocation11 + $0xb8] sm:$0xff]  }
  0x71   :  { %474 = vmatpush2.bf16.msra.mxu0 %v1359_v45 }
  0x72   :  { %723 = vmatpush2.bf16.msra.mxu1 %v1362_v46  ;;  %475 = vmatprep.subr.bf16.mxu0 %v1367_v47  ;;  %v1411_v46 = vld [vmem:[#allocation11 + $0x70] sm:$0xff]  }
  0x73   :  { %724 = vmatprep.subr.bf16.mxu1 %v1370_v48  ;;  %v1412_v47 = vld [vmem:[#allocation11 + $0xf0] sm:$0xff]  }
  0x74   :  { %v1413_v48 = vld [vmem:[#allocation11 + $0x30] sm:$0xff]  }
  0x75   :  { %476 = vmatpush2.bf16.msra.mxu0 %v1365_v49  ;;  %v1414_v49 = vld [vmem:[#allocation11 + $0xb0] sm:$0xff]  }
  0x76   :  { %725 = vmatpush2.bf16.msra.mxu1 %v1368_v50  ;;  %477 = vmatprep.subr.bf16.mxu0 %v1373_v51  ;;  %v1415_v50 = vld [vmem:[#allocation11 + $0x68] sm:$0xff]  }
  0x77   :  { %726 = vmatprep.subr.bf16.mxu1 %v1376_v52  ;;  %v1416_v51 = vld [vmem:[#allocation11 + $0xe8] sm:$0xff]  }
  0x78   :  { %v1417_v52 = vld [vmem:[#allocation11 + $0x28] sm:$0xff]  }
  0x79   :  { %478 = vmatpush2.bf16.msra.mxu0 %v1371_v53  ;;  %v1418_v53 = vld [vmem:[#allocation11 + $0xa8] sm:$0xff]  }
  0x7a   :  { %727 = vmatpush2.bf16.msra.mxu1 %v1374_v54  ;;  %479 = vmatprep.subr.bf16.mxu0 %v1379_v55  ;;  %v1419_v54 = vld [vmem:[#allocation11 + $0x60] sm:$0xff]  }
  0x7b   :  { %728 = vmatprep.subr.bf16.mxu1 %v1382_v56  ;;  %v1420_v55 = vld [vmem:[#allocation11 + $0xe0] sm:$0xff]  }
  0x7c   :  { %v1421_v56 = vld [vmem:[#allocation11 + $0x20] sm:$0xff]  }
  0x7d   :  { %480 = vmatpush2.bf16.msra.mxu0 %v1377_v57  ;;  %v1422_v57 = vld [vmem:[#allocation11 + $0xa0] sm:$0xff]  }
  0x7e   :  { %729 = vmatpush2.bf16.msra.mxu1 %v1380_v58  ;;  %481 = vmatprep.subr.bf16.mxu0 %v1385_v59  ;;  %v1423_v58 = vld [vmem:[#allocation11 + $0x58] sm:$0xff]  }
  0x7f   :  { %730 = vmatprep.subr.bf16.mxu1 %v1388_v60  ;;  %v1424_v59 = vld [vmem:[#allocation11 + $0xd8] sm:$0xff]  }
  0x80   :  { %v1425_v60 = vld [vmem:[#allocation11 + $0x18] sm:$0xff]  }
  0x81   :  { %482 = vmatpush2.bf16.msra.mxu0 %v1383_v61  ;;  %v1426_v61 = vld [vmem:[#allocation11 + $0x98] sm:$0xff]  }
  0x82   :  { %731 = vmatpush2.bf16.msra.mxu1 %v1386_v62  ;;  %483 = vmatprep.subr.bf16.mxu0 %v1391_v63  ;;  %v1427_v62 = vld [vmem:[#allocation11 + $0x50] sm:$0xff]  }
  0x83   :  { %732 = vmatprep.subr.bf16.mxu1 %v1394_v0  ;;  %v1428_v63 = vld [vmem:[#allocation11 + $0xd0] sm:$0xff]  }
  0x84   :  { %v1429_v0 = vld [vmem:[#allocation11 + $0x10] sm:$0xff]  }
  0x85   :  { %484 = vmatpush2.bf16.msra.mxu0 %v1389_v1  ;;  %v1430_v1 = vld [vmem:[#allocation11 + $0x90] sm:$0xff]  }
  0x86   :  { %733 = vmatpush2.bf16.msra.mxu1 %v1392_v2  ;;  %485 = vmatprep.subr.bf16.mxu0 %v1397_v3  ;;  %v1431_v2 = vld [vmem:[#allocation11 + $0x48] sm:$0xff]  }
  0x87   :  { %734 = vmatprep.subr.bf16.mxu1 %v1400_v4  ;;  %v1432_v3 = vld [vmem:[#allocation11 + $0xc8] sm:$0xff]  }
  0x88   :  { %v1433_v4 = vld [vmem:[#allocation11 + $0x8] sm:$0xff]  }
  0x89   :  { %486 = vmatpush2.bf16.msra.mxu0 %v1395_v5  ;;  %v1434_v5 = vld [vmem:[#allocation11 + $0x88] sm:$0xff]  }
  0x8a   :  { %735 = vmatpush2.bf16.msra.mxu1 %v1398_v6  ;;  %487 = vmatprep.subr.bf16.mxu0 %v1403_v7  ;;  %v1435_v6 = vld [vmem:[#allocation11 + $0x40] sm:$0xff]  }
  0x8b   :  { %736 = vmatprep.subr.bf16.mxu1 %v1406_v8  ;;  %v1436_v7 = vld [vmem:[#allocation11 + $0xc0] sm:$0xff]  }
  0x8c   :  { %v1437_v8 = vld [vmem:[#allocation11] sm:$0xff]  }
  0x8d   :  { %488 = vmatpush2.bf16.msra.mxu0 %v1401_v9  ;;  %v1438_v9 = vld [vmem:[#allocation11 + $0x80] sm:$0xff]  }
  0x8e   :  { %737 = vmatpush2.bf16.msra.mxu1 %v1404_v10  ;;  %1251 = vmatprep.subr.bf16.mxu0 %v1407_v11  ;;  %v285_v10 = vld [vmem:[%s1711_s4] sm:$0x3] }
  0x8f   :  { %1273 = vmatprep.subr.bf16.mxu1 %v1408_v12  ;;  %v534_v11 = vld [vmem:[%s1713_s6] sm:$0x3]  ;;  %v290_v12 = vrot.slane %v285_v10, %v1682_v15  ;;  %v294_v16 = vrot.slane %v285_v10, %v1684_v18 }
  0x90   :  { %v539_v14 = vrot.slane %v534_v11, %v1682_v15  ;;  %v543_v17 = vrot.slane %v534_v11, %v1684_v18 }
 0x110   :  { %v197_v24 = vpop.f32.mrf.mxu0 }
 0x111   :  { %v238_v25 = vpop.f32.mrf.mxu1  ;;  %v198_v26 = vadd.f32 %v197_v24, %v119_v20 }
 0x112   :  { %v239_v27 = vadd.f32 %v238_v25, %v127_v21  ;;  %v199_v28 = vpop.f32.mrf.mxu0 }
 0x113   :  { %v240_v29 = vpop.f32.mrf.mxu1  ;;  %v200_v31 = vadd.f32 %v199_v28, %v123_v22  ;;  %v245_v33 = vmax.f32 %v198_v26, 0.0 }
 0x114   :  { %v247_v30 = vmax.f32 %v239_v27, 0.0  ;;  %v241_v32 = vadd.f32 %v240_v29, %v131_v23  ;;  %v201_v34 = vpop.f32.mrf.mxu0 }
 0x115   :  { %v242_v35 = vpop.f32.mrf.mxu1  ;;  %v246_v36 = vmax.f32 %v200_v31, 0.0  ;;  %v249_v45 = vpack.c.bf16 %v245_v33, %v245_v33 }
 0x116   :  { %v248_v37 = vmax.f32 %v241_v32, 0.0  ;;  %v251_v38 = vpack.c.bf16 %v247_v30, %v247_v30  ;;  %v202_v39 = vpop.f32.mrf.mxu0 }
 0x117   :  { %v243_v40 = vpop.f32.mrf.mxu1  ;;  %v250_v41 = vpack.c.bf16 %v246_v36, %v246_v36  ;;  %v1218_v39 = vld [vmem:[%s1715_s8] ss:$0 sm:$0xff]  ;;  %s1606_s8 = smov [#allocation13]  }
 0x118   :  { %v252_v42 = vpack.c.bf16 %v248_v37, %v248_v37  ;;  %s1134_s20 = sshll.u32 %s1606_s8, 4  ;;  %s1135_s20 = int_to_ptr.vmem [resolvable:$true] %s1134_s20 }
 0x119   :  { %489 = vmatprep.mubr.bf16.mxu0 %v250_v41  ;;  %s1565_s21 = scalar_lea.vmem %s1135_s20, 128  ;;  %p1570_p3 = scmp.lt.s32.totalorder %s1135_s20, %s1135_s20 }
 0x11a   :  { %738 = vmatprep.mubr.bf16.mxu1 %v252_v42  ;;  %490 = vmatmul.mubr.bf16.vlgmr.msra.gmra.mxu0 %v249_v45  ;;  %v1095_v42 = vand.u32 127, %v116_v13  ;;  %p1566_p2 = scmp.ne.s32.totalorder %s1135_s20, %s1565_s21  ;;  %p1571_p4 = scmp.lt.s32.totalorder %s1565_s21, %s1565_s21 }
 0x11b   :  { %739 = vmatmul.mubr.bf16.vlgmr.msra.gmra.mxu1 %v251_v38  ;;  %1252 = vmatpush3.bf16.msra.mxu0 %v1409_v43 }
 0x11c   :  { %1274 = vmatpush3.bf16.msra.mxu1 %v1410_v44  ;;  %1253 = vmatprep.subr.bf16.mxu0 %v1411_v46  ;;  %vm1096_vm2 = vcmp.lt.s32.totalorder %v1095_v42, 4  ;;  %vm1119_vm3 = vcmp.eq.s32.totalorder %v1095_v42, 4  ;;  %vm1097_vm4 = vcmp.ge.s32.totalorder %v1095_v42, 8  ;;  %vm1098_vm5 = vcmp.lt.s32.totalorder %v1095_v42, 12  ;;  %p1572_p5 = por %p1571_p4, %p1570_p3 }
 0x11d   :  { %1275 = vmatprep.subr.bf16.mxu1 %v1412_v47  ;;  %vm1122_vm6 = vcmp.eq.s32.totalorder %v1095_v42, 5  ;;  %vm1099_vm7 = vmand %vm1097_vm4, %vm1098_vm5 }
 0x11e   :  { %p1573_p6 = pnand %p1572_p5, %p1566_p2 }
 0x11f   :  { %1254 = vmatpush3.bf16.msra.mxu0 %v1413_v48 }
 0x120   :  { %1276 = vmatpush3.bf16.msra.mxu1 %v1414_v49  ;;  %1255 = vmatprep.subr.bf16.mxu0 %v1415_v50 }
 0x121   :  { %1277 = vmatprep.subr.bf16.mxu1 %v1416_v51 }
 0x123   :  { %1256 = vmatpush3.bf16.msra.mxu0 %v1417_v52 }
 0x124   :  { %1278 = vmatpush3.bf16.msra.mxu1 %v1418_v53  ;;  %1257 = vmatprep.subr.bf16.mxu0 %v1419_v54 }
 0x125   :  { %1279 = vmatprep.subr.bf16.mxu1 %v1420_v55 }
 0x127   :  { %1258 = vmatpush3.bf16.msra.mxu0 %v1421_v56 }
 0x128   :  { %1280 = vmatpush3.bf16.msra.mxu1 %v1422_v57  ;;  %1259 = vmatprep.subr.bf16.mxu0 %v1423_v58 }
 0x129   :  { %1281 = vmatprep.subr.bf16.mxu1 %v1424_v59 }
 0x12b   :  { %1260 = vmatpush3.bf16.msra.mxu0 %v1425_v60 }
 0x12c   :  { %1282 = vmatpush3.bf16.msra.mxu1 %v1426_v61  ;;  %1261 = vmatprep.subr.bf16.mxu0 %v1427_v62 }
 0x12d   :  { %1283 = vmatprep.subr.bf16.mxu1 %v1428_v63 }
 0x12f   :  { %1262 = vmatpush3.bf16.msra.mxu0 %v1429_v0 }
 0x130   :  { %1284 = vmatpush3.bf16.msra.mxu1 %v1430_v1  ;;  %1263 = vmatprep.subr.bf16.mxu0 %v1431_v2 }
 0x131   :  { %1285 = vmatprep.subr.bf16.mxu1 %v1432_v3 }
 0x133   :  { %1264 = vmatpush3.bf16.msra.mxu0 %v1433_v4 }
 0x134   :  { %1286 = vmatpush3.bf16.msra.mxu1 %v1434_v5  ;;  %1265 = vmatprep.subr.bf16.mxu0 %v1435_v6 }
 0x135   :  { %1287 = vmatprep.subr.bf16.mxu1 %v1436_v7 }
 0x137   :  { %1266 = vmatpush3.bf16.msra.mxu0 %v1437_v8 }
 0x138   :  { %1288 = vmatpush3.bf16.msra.mxu1 %v1438_v9 }
 0x1da   :  { %v491_v19 = vpop.f32.mrf.mxu0 }
 0x1db   :  { %v740_v20 = vpop.f32.mrf.mxu1  ;;  %v492_v21 = vadd.f32 %v491_v19, %v290_v12 }
 0x1dc   :  { %v741_v22 = vadd.f32 %v740_v20, %v539_v14  ;;  %v493_v23 = vpop.f32.mrf.mxu0 }
 0x1dd   :  { %v742_v24 = vpop.f32.mrf.mxu1  ;;  %v494_v25 = vadd.f32 %v493_v23, %v294_v16  ;;  %v498_v27 = vmax.f32 %v492_v21, 0.0 }
 0x1de   :  { %v743_v26 = vadd.f32 %v742_v24, %v543_v17  ;;  %v747_v28 = vmax.f32 %v741_v22, 0.0  ;;  %v495_v29 = vpop.f32.mrf.mxu0 }
 0x1df   :  { %v744_v30 = vpop.f32.mrf.mxu1  ;;  %v499_v31 = vmax.f32 %v494_v25, 0.0  ;;  %v500_v36 = vpack.c.bf16 %v498_v27, %v498_v27 }
 0x1e0   :  { %v748_v32 = vmax.f32 %v743_v26, 0.0  ;;  %v496_v33 = vpop.f32.mrf.mxu0  ;;  %v749_v18 = vpack.c.bf16 %v747_v28, %v747_v28 }
 0x1e1   :  { %v745_v15 = vpop.f32.mrf.mxu1  ;;  %v501_v34 = vpack.c.bf16 %v499_v31, %v499_v31 }
 0x1e2   :  { %v750_v35 = vpack.c.bf16 %v748_v32, %v748_v32 }
 0x1e3   :  { %1046 = vmatprep.mubr.bf16.mxu0 %v501_v34 }
 0x1e4   :  { %1086 = vmatprep.mubr.bf16.mxu1 %v750_v35  ;;  %1047 = vmatmul.mubr.bf16.vlgmr.msra.gmra.mxu0 %v500_v36 }
 0x1e5   :  { %1087 = vmatmul.mubr.bf16.vlgmr.msra.gmra.mxu1 %v749_v18 }
 0x2a4   :  { %v1267_v37 = vpop.f32.mrf.mxu0 }
 0x2a5   :  { %v1289_v38 = vpop.f32.mrf.mxu1 }
 0x2a6   :  { %v1268_v40 = vpop.f32.mrf.mxu0 }
 0x2a7   :  { %v1290_v41 = vpop.f32.mrf.mxu1  ;;  %v1269_v43 = vadd.f32 %v1268_v40, %v1267_v37 }
 0x2a8   :  { %v1270_v44 = vpop.f32.mrf.mxu0  ;;  %v1291_v47 = vadd.f32 %v1290_v41, %v1289_v38 }
 0x2a9   :  { %v1292_v45 = vpop.f32.mrf.mxu1  ;;  %v1049_v46 = vadd.f32 %v1269_v43, %v1218_v39 }
 0x2aa   :  { %v1271_v48 = vpop.f32.mrf.mxu0 }
 0x2ab   :  { %v1293_v49 = vpop.f32.mrf.mxu1  ;;  %v1089_v50 = vadd.f32 %v1291_v47, %v1049_v46 }
 0x2ad   :  { %v1100_v51 = vsel %vm1096_vm2, %v1089_v50, -inf  ;;  %v1120_v1 = vsel %vm1119_vm3, %v1089_v50, 0.0 }
 0x2ae   :  { %1101 = vmax.xlane.f32.xlu0 %v1100_v51 }
 0x337   :  { %v1102_v52 = vpop.xlane.xlu0 %1101 }
 0x338   :  { %v1103_v53 = vsub.f32 %v1100_v51, %v1102_v52  ;;  %v1112_v58 = vsub.f32 %v1089_v50, %v1102_v52 }
 0x33a   :  { %v1104_v54 = vmul.f32 1.442695, %v1103_v53 }
 0x33c   :  { %1439 = vpow2.f32 %v1104_v54 }
 0x349   :  { %v1440_v55 = vpop.eup %1439 }
 0x34a   :  { %1106 = vadd.xlane.f32.xlu0 %v1440_v55 }
 0x3d3   :  { %v1107_v56 = vpop.xlane.xlu0 %1106 }
 0x3d4   :  { %1441 = vlog2.f32 %v1107_v56 }
 0x3d5   :  { %1443 = vrcp.f32 %v1107_v56 }
 0x3e1   :  { %v1442_v13 = vpop.eup %1441 }
 0x3e2   :  { %v1444_v57 = vpop.eup %1443  ;;  %v1111_v59 = vmul.f32 0.6931472, %v1442_v13 }
 0x3e3   :  { %v1109_v61 = vmul.f32 %v1444_v57, %v1440_v55 }
 0x3e4   :  { %v1113_v60 = vsub.f32 %v1112_v58, %v1111_v59 }
 0x3e5   :  { %v1121_v3 = vadd.f32 %v1120_v1, %v1109_v61 }
 0x3e6   :  { %v1114_v62 = vsel %vm1096_vm2, %v1113_v60, 0.0  ;;  %v1125_v6 = vsel %vm1099_vm7, %v1113_v60, 0.0 }
 0x3e7   :  { %v1115_v63 = vmul.f32 %v1114_v62, %v1109_v61 }
 0x3e9   :  { %1116 = vadd.xlane.f32.xlu1 %v1115_v63 }
 0x472   :  { %v1117_v0 = vpop.xlane.xlu1 %1116 }
 0x473   :  { %v1118_v2 = vsub.f32 0.0, %v1117_v0 }
 0x475   :  { %v1123_v4 = vsel %vm1122_vm6, %v1118_v2, 0.0 }
 0x476   :  { %v1124_v5 = vadd.f32 %v1123_v4, %v1121_v3 }
 0x478   :  { %v1126_v7 = vadd.f32 %v1125_v6, %v1124_v5 }
 0x47a   :  { %1127 = vst [vmem:[#allocation13] sm:$0xff] %v1126_v7 }
 0x47b   :  { %1576 = shalt.err (!%p1573_p6)
}
 0x47c   :  { %1137 = dma.vmem_to_hbm [thread:$0]  %s1135_s20, 128, %s1716_s9, [#allocation4]  }
 0x47d   :  { %1593 = dma.done.wait [#allocation4], 128  }
 0x47e   :  { %1594 = vsyncadd [#allocation4], 4294967168 }
 0x47f   :  { %1141 = vsyncpa [#allocation3], 1 }
 0x480   :  { %1142 = vsyncpa [#allocation6], 1 }
 0x481   :  { %1143 = vsyncpa [#allocation9], 1 }
 0x482   :  { %1144 = vsyncpa [#allocation12], 1 }
 0x483   :  { %1145 = vsyncpa [#allocation4], 1 }

</bundles_post_ra>
